<compile_context>
chip_gen: v7x
topology: tpu7x:2x2x1
jax: 0.10.0
libtpu: 0.0.40
codegen_flags: <defaults>
</compile_context>

<pallas_src>
import jax
import jax.numpy as jnp
from jax.experimental import pallas as pl
from jax.experimental.pallas import tpu as pltpu

# Original model_3 dims
D_IN = 28 * 28      # 784
H1 = 14 * 14        # 196
H2 = 7 * 7          # 49
D_OUT = 10

# Lane-aligned (padded) dims
H1P = 256           # 196 -> 256
H2P = 128           # 49  -> 128
D_OUTP = 128        # 10  -> 128  (lane-dense output store)


def _round_up(x, m):
    return (x + m - 1) // m * m


def mlp3_kernel(x_ref, w1_ref, b1_ref, w2_ref, b2_ref, w3_ref, b3_ref, o_ref):
    # Layer 1: 784 -> 256 (196 real + zero-padded cols), sigmoid.
    h1 = jnp.dot(x_ref[...], w1_ref[...], preferred_element_type=jnp.float32)
    h1 = jax.nn.sigmoid(h1 + b1_ref[...])        # exp-based -> EUP slot, hidden behind MXU
    # Layer 2: 256 -> 128. Padded h1 lanes (=0.5) hit zero rows of w2 -> no effect.
    h2 = jnp.dot(h1.astype(w2_ref.dtype), w2_ref[...], preferred_element_type=jnp.float32)
    h2 = jax.nn.sigmoid(h2 + b2_ref[...])
    # Layer 3: 128 -> 128 (10 real logits + zero pad), no activation.
    h3 = jnp.dot(h2.astype(w3_ref.dtype), w3_ref[...], preferred_element_type=jnp.float32)
    o_ref[...] = (h3 + b3_ref[...]).astype(o_ref.dtype)


def mlp3_forward(x, w1, b1, w2, b2, w3, b3, *, tile_b=128):
    """x: [B, 784] f32.  w*/b*: padded params from pad_params (w* bf16, b* f32).
    Returns [B, 10] f32 logits."""
    B = x.shape[0]
    # Batch grid: tile up to 128 rows per step so larger batches amortize the
    # per-grid-step overhead, keep weights VMEM-resident (constant index_map),
    # and let v7x's two TensorCores split the batch ("parallel" axis).
    tb = min(tile_b, _round_up(B, 8))
    Bp = _round_up(B, tb)
    xb = x.astype(jnp.bfloat16)
    if Bp != B:
        xb = jnp.pad(xb, ((0, Bp - B), (0, 0)))
    nb = Bp // tb

    # Weights/biases: full-array blocks, same block at every grid step.
    # (Default double-buffering is left in place consciously: total weight
    #  footprint is ~0.4 MiB bf16, negligible vs VMEM on all generations.)
    def weight_spec(a):
        return pl.BlockSpec(a.shape, lambda i: (0,) * a.ndim)

    out = pl.pallas_call(
        mlp3_kernel,
        out_shape=jax.ShapeDtypeStruct((Bp, D_OUTP), jnp.float32),
        grid=(nb,),
        in_specs=[
            pl.BlockSpec((tb, D_IN), lambda i: (i, 0)),
            weight_spec(w1), weight_spec(b1),
            weight_spec(w2), weight_spec(b2),
            weight_spec(w3), weight_spec(b3),
        ],
        out_specs=pl.BlockSpec((tb, D_OUTP), lambda i: (i, 0)),
        compiler_params=pltpu.CompilerParams(
            dimension_semantics=("parallel",)),
    )(xb, w1, b1, w2, b2, w3, b3)
    return out[:B, :D_OUT]


def init_linear(key, in_features, out_features):
    # Deterministic init matching PyTorch nn.Linear's default scheme:
    # U(-1/sqrt(in), 1/sqrt(in)) for both weight and bias. Stored as [in, out].
    kw, kb = jax.random.split(key)
    bound = 1.0 / jnp.sqrt(jnp.float32(in_features))
    w = jax.random.uniform(kw, (in_features, out_features), jnp.float32, -bound, bound)
    b = jax.random.uniform(kb, (1, out_features), jnp.float32, -bound, bound)
    return w, b


def pad_params(w, b, in_pad, out_pad):
    # Zero-pad weight rows (so padded previous-layer activations contribute nothing)
    # and weight/bias columns (so padded output lanes are exactly zero pre-activation).
    w = jnp.pad(w, ((0, in_pad - w.shape[0]), (0, out_pad - w.shape[1])))
    b = jnp.pad(b, ((0, 0), (0, out_pad - b.shape[1])))
    # bf16 weights for the MXU fast path; biases stay f32 (added post-matmul in f32).
    return w.astype(jnp.bfloat16), b.astype(jnp.float32)


if __name__ == "__main__":
    key = jax.random.PRNGKey(0)
    k_x, k1, k2, k3 = jax.random.split(key, 4)

    B = 8  # small batch
    x = jax.random.normal(k_x, (B, D_IN), dtype=jnp.float32)

    w1, b1 = init_linear(k1, D_IN, H1)
    w2, b2 = init_linear(k2, H1, H2)
    w3, b3 = init_linear(k3, H2, D_OUT)

    # Lane-dense, bf16 padded params fed to the kernel.
    w1p, b1p = pad_params(w1, b1, D_IN, H1P)
    w2p, b2p = pad_params(w2, b2, H1P, H2P)
    w3p, b3p = pad_params(w3, b3, H2P, D_OUTP)

    out = mlp3_forward(x, w1p, b1p, w2p, b2p, w3p, b3p)
    out = jax.block_until_ready(out)

    # Pure-JAX f32 reference on the original (unpadded) params.
    ref = jax.nn.sigmoid(x @ w1 + b1)
    ref = jax.nn.sigmoid(ref @ w2 + b2)
    ref = ref @ w3 + b3

    assert out.shape == (B, D_OUT)
    # bf16 matmul inputs (f32 accumulation) -> loosened tolerance vs f32 reference.
    assert jnp.allclose(out, ref, atol=2e-2, rtol=2e-2), float(jnp.max(jnp.abs(out - ref)))
    print("KERNEL_OK")
</pallas_src>

<mosaic_0001>
module attributes {stable_mosaic.version = 11 : i64} {
  func.func @mlp3_kernel(%arg0: i32, %arg1: memref<8x784xbf16, #tpu.memory_space<vmem>>, %arg2: memref<784x256xbf16, #tpu.memory_space<vmem>>, %arg3: memref<1x256xf32, #tpu.memory_space<vmem>>, %arg4: memref<256x128xbf16, #tpu.memory_space<vmem>>, %arg5: memref<1x128xf32, #tpu.memory_space<vmem>>, %arg6: memref<128x128xbf16, #tpu.memory_space<vmem>>, %arg7: memref<1x128xf32, #tpu.memory_space<vmem>>, %arg8: memref<8x128xf32, #tpu.memory_space<vmem>>) attributes {dimension_semantics = [#tpu.dimension_semantics<parallel>], iteration_bounds = array<i64: 1>, scalar_prefetch = 0 : i64, scratch_operands = 0 : i64, tpu.core_type = #tpu.core_type<tc>, window_params = [{transform_indices = @transform_0, window_bounds = array<i64: 8, 784>}, {pipeline_mode = #tpu.pipeline_mode<synchronous>, transform_indices = @transform_1, window_bounds = array<i64: 784, 256>}, {pipeline_mode = #tpu.pipeline_mode<synchronous>, transform_indices = @transform_2, window_bounds = array<i64: 1, 256>}, {pipeline_mode = #tpu.pipeline_mode<synchronous>, transform_indices = @transform_3, window_bounds = array<i64: 256, 128>}, {pipeline_mode = #tpu.pipeline_mode<synchronous>, transform_indices = @transform_4, window_bounds = array<i64: 1, 128>}, {pipeline_mode = #tpu.pipeline_mode<synchronous>, transform_indices = @transform_5, window_bounds = array<i64: 128, 128>}, {pipeline_mode = #tpu.pipeline_mode<synchronous>, transform_indices = @transform_6, window_bounds = array<i64: 1, 128>}, {transform_indices = @transform_7, window_bounds = array<i64: 8, 128>}]} {
    %c0 = arith.constant 0 : index
    %c0_0 = arith.constant 0 : index
    %0 = vector.load %arg1[%c0, %c0_0] : memref<8x784xbf16, #tpu.memory_space<vmem>>, vector<8x784xbf16>
    %c0_1 = arith.constant 0 : index
    %c0_2 = arith.constant 0 : index
    %1 = vector.load %arg2[%c0_1, %c0_2] : memref<784x256xbf16, #tpu.memory_space<vmem>>, vector<784x256xbf16>
    %cst = arith.constant dense<0.000000e+00> : vector<8x256xf32>
    %2 = tpu.matmul %0, %1, %cst {dimension_numbers = #tpu.dot_dimension_numbers<[1], [0], [0], [1], [0, 0, 1, 1], [], []>} : vector<8x784xbf16>, vector<784x256xbf16>, vector<8x256xf32> -> vector<8x256xf32>
    %c0_3 = arith.constant 0 : index
    %c0_4 = arith.constant 0 : index
    %3 = vector.load %arg3[%c0_3, %c0_4] : memref<1x256xf32, #tpu.memory_space<vmem>>, vector<1x256xf32>
    %4 = vector.broadcast %3 : vector<1x256xf32> to vector<8x256xf32>
    %5 = arith.addf %2, %4 : vector<8x256xf32>
    %6 = arith.negf %5 : vector<8x256xf32>
    %7 = math.exp %6 : vector<8x256xf32>
    %cst_5 = arith.constant 1.000000e+00 : f32
    %8 = vector.broadcast %cst_5 : f32 to vector<8x256xf32>
    %9 = arith.addf %8, %7 : vector<8x256xf32>
    %10 = arith.divf %8, %9 : vector<8x256xf32>
    %11 = arith.truncf %10 : vector<8x256xf32> to vector<8x256xbf16>
    %c0_6 = arith.constant 0 : index
    %c0_7 = arith.constant 0 : index
    %12 = vector.load %arg4[%c0_6, %c0_7] : memref<256x128xbf16, #tpu.memory_space<vmem>>, vector<256x128xbf16>
    %cst_8 = arith.constant dense<0.000000e+00> : vector<8x128xf32>
    %13 = tpu.matmul %11, %12, %cst_8 {dimension_numbers = #tpu.dot_dimension_numbers<[1], [0], [0], [1], [0, 0, 1, 1], [], []>} : vector<8x256xbf16>, vector<256x128xbf16>, vector<8x128xf32> -> vector<8x128xf32>
    %c0_9 = arith.constant 0 : index
    %c0_10 = arith.constant 0 : index
    %14 = vector.load %arg5[%c0_9, %c0_10] : memref<1x128xf32, #tpu.memory_space<vmem>>, vector<1x128xf32>
    %15 = vector.broadcast %14 : vector<1x128xf32> to vector<8x128xf32>
    %16 = arith.addf %13, %15 : vector<8x128xf32>
    %17 = arith.negf %16 : vector<8x128xf32>
    %18 = math.exp %17 : vector<8x128xf32>
    %cst_11 = arith.constant 1.000000e+00 : f32
    %19 = vector.broadcast %cst_11 : f32 to vector<8x128xf32>
    %20 = arith.addf %19, %18 : vector<8x128xf32>
    %21 = arith.divf %19, %20 : vector<8x128xf32>
    %22 = arith.truncf %21 : vector<8x128xf32> to vector<8x128xbf16>
    %c0_12 = arith.constant 0 : index
    %c0_13 = arith.constant 0 : index
    %23 = vector.load %arg6[%c0_12, %c0_13] : memref<128x128xbf16, #tpu.memory_space<vmem>>, vector<128x128xbf16>
    %cst_14 = arith.constant dense<0.000000e+00> : vector<8x128xf32>
    %24 = tpu.matmul %22, %23, %cst_14 {dimension_numbers = #tpu.dot_dimension_numbers<[1], [0], [0], [1], [0, 0, 1, 1], [], []>} : vector<8x128xbf16>, vector<128x128xbf16>, vector<8x128xf32> -> vector<8x128xf32>
    %c0_15 = arith.constant 0 : index
    %c0_16 = arith.constant 0 : index
    %25 = vector.load %arg7[%c0_15, %c0_16] : memref<1x128xf32, #tpu.memory_space<vmem>>, vector<1x128xf32>
    %26 = vector.broadcast %25 : vector<1x128xf32> to vector<8x128xf32>
    %27 = arith.addf %24, %26 : vector<8x128xf32>
    %c0_17 = arith.constant 0 : index
    %c0_18 = arith.constant 0 : index
    %28 = vector.load %arg8[%c0_17, %c0_18] : memref<8x128xf32, #tpu.memory_space<vmem>>, vector<8x128xf32>
    tpu.vector_store %arg8[%c0_17, %c0_18], %27 {strides = array<i32>} : memref<8x128xf32, #tpu.memory_space<vmem>>, vector<8x128xf32>,
    return
  }
  func.func @transform_0(%arg0: i32) -> (i32, i32) {
    %c0_i32 = arith.constant 0 : i32
    %c0_i32_0 = arith.constant 0 : i32
    return %arg0, %c0_i32 : i32, i32
  }
  func.func @transform_1(%arg0: i32) -> (i32, i32) {
    %c0_i32 = arith.constant 0 : i32
    %c0_i32_0 = arith.constant 0 : i32
    %c0_i32_1 = arith.constant 0 : i32
    return %c0_i32, %c0_i32_0 : i32, i32
  }
  func.func @transform_2(%arg0: i32) -> (i32, i32) {
    %c0_i32 = arith.constant 0 : i32
    %c0_i32_0 = arith.constant 0 : i32
    %c0_i32_1 = arith.constant 0 : i32
    return %c0_i32, %c0_i32_0 : i32, i32
  }
  func.func @transform_3(%arg0: i32) -> (i32, i32) {
    %c0_i32 = arith.constant 0 : i32
    %c0_i32_0 = arith.constant 0 : i32
    %c0_i32_1 = arith.constant 0 : i32
    return %c0_i32, %c0_i32_0 : i32, i32
  }
  func.func @transform_4(%arg0: i32) -> (i32, i32) {
    %c0_i32 = arith.constant 0 : i32
    %c0_i32_0 = arith.constant 0 : i32
    %c0_i32_1 = arith.constant 0 : i32
    return %c0_i32, %c0_i32_0 : i32, i32
  }
  func.func @transform_5(%arg0: i32) -> (i32, i32) {
    %c0_i32 = arith.constant 0 : i32
    %c0_i32_0 = arith.constant 0 : i32
    %c0_i32_1 = arith.constant 0 : i32
    return %c0_i32, %c0_i32_0 : i32, i32
  }
  func.func @transform_6(%arg0: i32) -> (i32, i32) {
    %c0_i32 = arith.constant 0 : i32
    %c0_i32_0 = arith.constant 0 : i32
    %c0_i32_1 = arith.constant 0 : i32
    return %c0_i32, %c0_i32_0 : i32, i32
  }
  func.func @transform_7(%arg0: i32) -> (i32, i32) {
    %c0_i32 = arith.constant 0 : i32
    %c0_i32_0 = arith.constant 0 : i32
    return %arg0, %c0_i32 : i32, i32
  }
}

</mosaic_0001>

<bundles_post_ra>
// kernel: tpu_custom_call.1
= control target key start
LH: loop header
LB: loop body
LE: loop exit
PB: predicated region body
PF: predicated region fallthrough
CT: control target
= control target key end

     0   :  { %12 = vsyncpa [#allocation3], 0  ;;  %s1853_s0 = inlined_call_operand.hbm [shape: bf16[8,784], index: 0, kind: input, shape index: {}]   ;;  %s1854_s1 = inlined_call_operand.hbm [shape: bf16[784,256], index: 1, kind: input, shape index: {}]   ;;  %s1855_s2 = inlined_call_operand.vmem [shape: f32[1,256], index: 2, kind: input, shape index: {}]   ;;  %s1856_s3 = inlined_call_operand.hbm [shape: bf16[256,128], index: 3, kind: input, shape index: {}]   ;;  %s1857_s4 = inlined_call_operand.vmem [shape: f32[1,128], index: 4, kind: input, shape index: {}]   ;;  %s1858_s5 = inlined_call_operand.hbm [shape: bf16[128,128], index: 5, kind: input, shape index: {}]   ;;  %s1859_s6 = inlined_call_operand.vmem [shape: f32[1,128], index: 6, kind: input, shape index: {}]   ;;  %s1860_s7 = inlined_call_operand.hbm [shape: f32[8,128], index: 7, kind: output, shape index: {}]  }
   0x1   :  { %13 = vsyncpa [#allocation6], 0 }
   0x2   :  { %14 = vsyncpa [#allocation9], 0 }
   0x3   :  { %15 = vsyncpa [#allocation4], 0  ;;  %s1720_s24 = smov [#allocation5]   ;;  %s1602_s28 = scalar_lea.hbm %s1854_s1, 12544 }
   0x4   :  { %s31_s25 = sshll.u32 %s1720_s24, 4  ;;  %p1603_p0 = scmp.ne.s32.totalorder %s1854_s1, %s1602_s28  ;;  %s32_s25 = int_to_ptr.vmem [resolvable:$true] %s31_s25 }
   0x5   :  { %p1606_p1 = scmp.lt.u32.totalorder %s1602_s28, %s1854_s1 }
   0x7   :  { %p1608_p2 = pnand %p1606_p1, %p1603_p0 }
   0x9   :  { %1611 = shalt.err (!%p1608_p2)
}
   0xa   :  { %s1612_s10 = scalar_lea.vmem %s32_s25, 12544  ;;  %p1617_p4 = scmp.lt.s32.totalorder %s32_s25, %s32_s25 }
   0xb   :  { %p1613_p3 = scmp.ne.s32.totalorder %s32_s25, %s1612_s10  ;;  %p1618_p5 = scmp.lt.s32.totalorder %s1612_s10, %s1612_s10 }
   0xd   :  { %p1619_p6 = por %p1618_p5, %p1617_p4 }
   0xf   :  { %p1620_p7 = pnand %p1619_p6, %p1613_p3 }
  0x11   :  { %1623 = shalt.err (!%p1620_p7)
}
  0x12   :  { %s1721_s11 = smov 128   ;;  %s1722_s12 = smov 8  }
  0x13   :  { %37 = dma.hbm_to_vmem [thread:$0]  %s1854_s1, 12544, %s32_s25, [#allocation6], %s1721_s11, %s1721_s11, %s1722_s12  }
  0x14   :  { %s1723_s15 = smov [#allocation2]   ;;  %s1724_s17 = smov [#allocation7]  }
  0x15   :  { %s22_s16 = sshll.u32 %s1723_s15, 4  ;;  %s45_s18 = sshll.u32 %s1724_s17, 4  ;;  %s23_s16 = int_to_ptr.vmem [resolvable:$true] %s22_s16  ;;  %s46_s18 = int_to_ptr.vmem [resolvable:$true] %s45_s18 }
  0x16   :  { %s1624_s21 = scalar_lea.hbm %s1853_s0, 448 }
  0x17   :  { %p1625_p8 = scmp.ne.s32.totalorder %s1853_s0, %s1624_s21  ;;  %p1628_p9 = scmp.lt.u32.totalorder %s1624_s21, %s1853_s0 }
  0x19   :  { %p1630_p10 = pnand %p1628_p9, %p1625_p8 }
  0x1b   :  { %1633 = shalt.err (!%p1630_p10)
}
  0x1c   :  { %s1634_s1 = scalar_lea.vmem %s23_s16, 448  ;;  %p1639_p12 = scmp.lt.s32.totalorder %s23_s16, %s23_s16 }
  0x1d   :  { %p1635_p11 = scmp.ne.s32.totalorder %s23_s16, %s1634_s1  ;;  %p1640_p13 = scmp.lt.s32.totalorder %s1634_s1, %s1634_s1 }
  0x1f   :  { %p1641_p0 = por %p1640_p13, %p1639_p12 }
  0x21   :  { %p1642_p1 = pnand %p1641_p0, %p1635_p11 }
  0x23   :  { %1645 = shalt.err (!%p1642_p1)
}
  0x24   :  { %25 = dma.hbm_to_vmem [thread:$0]  %s1853_s0, 448, %s23_s16, [#allocation3]  }
  0x25   :  { %s1646_s30 = scalar_lea.hbm %s1856_s3, 2048 }
  0x26   :  { %p1647_p2 = scmp.ne.s32.totalorder %s1856_s3, %s1646_s30  ;;  %p1650_p3 = scmp.lt.u32.totalorder %s1646_s30, %s1856_s3 }
  0x28   :  { %p1652_p4 = pnand %p1650_p3, %p1647_p2 }
  0x2a   :  { %1655 = shalt.err (!%p1652_p4)
}
  0x2b   :  { %s1656_s12 = scalar_lea.vmem %s46_s18, 2048  ;;  %p1661_p6 = scmp.lt.s32.totalorder %s46_s18, %s46_s18 }
  0x2c   :  { %p1657_p5 = scmp.ne.s32.totalorder %s46_s18, %s1656_s12  ;;  %p1662_p7 = scmp.lt.s32.totalorder %s1656_s12, %s1656_s12 }
  0x2e   :  { %p1663_p8 = por %p1662_p7, %p1661_p6 }
  0x30   :  { %p1664_p9 = pnand %p1663_p8, %p1657_p5 }
  0x32   :  { %1667 = shalt.err (!%p1664_p9)
}
  0x33   :  { %s1725_s0 = smov 64   ;;  %s1726_s13 = smov 4  }
  0x34   :  { %51 = dma.hbm_to_vmem [thread:$0]  %s1856_s3, 2048, %s46_s18, [#allocation6], %s1725_s0, %s1725_s0, %s1726_s13  }
  0x35   :  { %s1727_s16 = smov [#allocation8]   ;;  %s1668_s21 = scalar_lea.hbm %s1858_s5, 1024 }
  0x36   :  { %s59_s17 = sshll.u32 %s1727_s16, 4  ;;  %p1669_p10 = scmp.ne.s32.totalorder %s1858_s5, %s1668_s21  ;;  %s60_s17 = int_to_ptr.vmem [resolvable:$true] %s59_s17 }
  0x37   :  { %p1672_p11 = scmp.lt.u32.totalorder %s1668_s21, %s1858_s5 }
  0x39   :  { %p1674_p12 = pnand %p1672_p11, %p1669_p10 }
  0x3b   :  { %1677 = shalt.err (!%p1674_p12)
}
  0x3c   :  { %s1678_s1 = scalar_lea.vmem %s60_s17, 1024  ;;  %p1683_p0 = scmp.lt.s32.totalorder %s60_s17, %s60_s17 }
  0x3d   :  { %p1679_p13 = scmp.ne.s32.totalorder %s60_s17, %s1678_s1  ;;  %p1684_p1 = scmp.lt.s32.totalorder %s1678_s1, %s1678_s1 }
  0x3f   :  { %p1685_p2 = por %p1684_p1, %p1683_p0 }
  0x41   :  { %p1686_p3 = pnand %p1685_p2, %p1679_p13 }
  0x43   :  { %1689 = shalt.err (!%p1686_p3)
}
  0x44   :  { %65 = dma.hbm_to_vmem [thread:$0]  %s1858_s5, 1024, %s60_s17, [#allocation9], %s1725_s0, %s1725_s0, %s1726_s13  }
  0x45   :  { %1712 = dma.done.wait [#allocation3], 448  }
  0x46   :  { %1713 = vsyncadd [#allocation3], 4294966848 }
  0x47   :  { %1714 = dma.done.wait [#allocation6], 14592  }
  0x48   :  { %1715 = vsyncadd [#allocation6], 4294952704 }
  0x49   :  { %1716 = dma.done.wait [#allocation9], 1024  }
  0x4a   :  { %1717 = vsyncadd [#allocation9], 4294966272  ;;  %v1412_v0 = vld [vmem:[#allocation5 + $0x104] ss:$8 sps:$4 sm:$0xff]   ;;  %v1414_v1 = vld [vmem:[#allocation5 + $0x100] ss:$8 sps:$4 sm:$0xff]  }
  0x4b   :  { %754 = vmatprep.subr.bf16.mxu0 %v1412_v0  ;;  %v1415_v2 = vld [vmem:[#allocation5 + $0x114] ss:$8 sps:$4 sm:$0xff]   ;;  %v1417_v3 = vld [vmem:[#allocation5 + $0x110] ss:$8 sps:$4 sm:$0xff]   ;;  %v1418_v4 = vld [vmem:[#allocation5 + $0x124] ss:$8 sps:$4 sm:$0xff]  }
  0x4c   :  { %755 = vmatpush1.bf16.msra.mxu0 %v1414_v1  ;;  %v1420_v5 = vld [vmem:[#allocation5 + $0x120] ss:$8 sps:$4 sm:$0xff]   ;;  %v1421_v6 = vld [vmem:[#allocation5 + $0x134] ss:$8 sps:$4 sm:$0xff]   ;;  %v1423_v7 = vld [vmem:[#allocation5 + $0x130] ss:$8 sps:$4 sm:$0xff]  }
  0x4d   :  { %756 = vmatprep.subr.bf16.mxu0 %v1415_v2  ;;  %v1424_v8 = vld [vmem:[#allocation5 + $0x144] ss:$8 sps:$4 sm:$0xff]   ;;  %v1426_v9 = vld [vmem:[#allocation5 + $0x140] ss:$8 sps:$4 sm:$0xff]   ;;  %v1427_v10 = vld [vmem:[#allocation5 + $0x154] ss:$8 sps:$4 sm:$0xff]  }
  0x4e   :  { %v1429_v11 = vld [vmem:[#allocation5 + $0x150] ss:$8 sps:$4 sm:$0xff]   ;;  %v1430_v12 = vld [vmem:[#allocation5 + $0x164] ss:$8 sps:$4 sm:$0xff]   ;;  %v1432_v15 = vld [vmem:[#allocation5 + $0x160] ss:$8 sps:$4 sm:$0xff]  }
  0x4f   :  { %v1820_v13 = vld [vmem:[#allocation2 + $0x8] sm:$0xff]  ;;  %v1433_v16 = vld [vmem:[#allocation5 + $0x174] ss:$8 sps:$4 sm:$0xff]   ;;  %v1473_v19 = vld [vmem:[#allocation5] ss:$8 sps:$4 sm:$0xff]   ;;  %vm709_vm0 = vcmask 130048  }
  0x50   :  { %757 = vmatpush1.bf16.msra.mxu0 %v1417_v3  ;;  %v1205_v14 = vcombine.high %v1820_v13, %v1820_v13  ;;  %v1468_v17 = vld [vmem:[#allocation5 + $0x4] ss:$8 sps:$4 sm:$0xff]   ;;  %v1435_v18 = vld [vmem:[#allocation5 + $0x170] ss:$8 sps:$4 sm:$0xff]   ;;  %v1474_v20 = vld [vmem:[#allocation5 + $0x14] ss:$8 sps:$4 sm:$0xff]   ;;  %v1204_v57 = vcombine.low %v1820_v13, %v1820_v13 }
  0x51   :  { %758 = vmatprep.subr.bf16.mxu0 %v1418_v4  ;;  %713 = vmatprep.subr.bf16.mxu1 %v1468_v17  ;;  %v1436_v21 = vld [vmem:[#allocation5 + $0x184] ss:$8 sps:$4 sm:$0xff]   ;;  %v1479_v22 = vld [vmem:[#allocation5 + $0x10] ss:$8 sps:$4 sm:$0xff]   ;;  %v1438_v24 = vld [vmem:[#allocation5 + $0x180] ss:$8 sps:$4 sm:$0xff]  }
  0x52   :  { %786 = vmatprep.mubr.bf16.mxu0 %v1205_v14  ;;  %714 = vmatpush1.bf16.msra.mxu1 %v1473_v19  ;;  %v1480_v23 = vld [vmem:[#allocation5 + $0x24] ss:$8 sps:$4 sm:$0xff]   ;;  %v1439_v25 = vld [vmem:[#allocation5 + $0x194] ss:$8 sps:$4 sm:$0xff]   ;;  %v1485_v26 = vld [vmem:[#allocation5 + $0x20] ss:$8 sps:$4 sm:$0xff]  }
  0x53   :  { %715 = vmatprep.subr.bf16.mxu1 %v1474_v20  ;;  %v1486_v27 = vld [vmem:[#allocation5 + $0x34] ss:$8 sps:$4 sm:$0xff]   ;;  %v1441_v28 = vld [vmem:[#allocation5 + $0x190] ss:$8 sps:$4 sm:$0xff]   ;;  %v1442_v29 = vld [vmem:[#allocation5 + $0x1a4] ss:$8 sps:$4 sm:$0xff]  }
  0x54   :  { %759 = vmatpush1.bf16.msra.mxu0 %v1420_v5  ;;  %v1491_v30 = vld [vmem:[#allocation5 + $0x30] ss:$8 sps:$4 sm:$0xff]   ;;  %v1492_v31 = vld [vmem:[#allocation5 + $0x44] ss:$8 sps:$4 sm:$0xff]   ;;  %v1444_v32 = vld [vmem:[#allocation5 + $0x1a0] ss:$8 sps:$4 sm:$0xff]  }
  0x55   :  { %760 = vmatprep.subr.bf16.mxu0 %v1421_v6  ;;  %v1445_v33 = vld [vmem:[#allocation5 + $0x1b4] ss:$8 sps:$4 sm:$0xff]   ;;  %v1497_v34 = vld [vmem:[#allocation5 + $0x40] ss:$8 sps:$4 sm:$0xff]   ;;  %v1447_v36 = vld [vmem:[#allocation5 + $0x1b0] ss:$8 sps:$4 sm:$0xff]  }
  0x56   :  { %716 = vmatpush1.bf16.msra.mxu1 %v1479_v22  ;;  %v1498_v35 = vld [vmem:[#allocation5 + $0x54] ss:$8 sps:$4 sm:$0xff]   ;;  %v1448_v37 = vld [vmem:[#allocation5 + $0x1c4] ss:$8 sps:$4 sm:$0xff]   ;;  %v1503_v38 = vld [vmem:[#allocation5 + $0x50] ss:$8 sps:$4 sm:$0xff]  }
  0x57   :  { %717 = vmatprep.subr.bf16.mxu1 %v1480_v23  ;;  %v1504_v39 = vld [vmem:[#allocation5 + $0x64] ss:$8 sps:$4 sm:$0xff]   ;;  %v1450_v40 = vld [vmem:[#allocation5 + $0x1c0] ss:$8 sps:$4 sm:$0xff]   ;;  %v1451_v41 = vld [vmem:[#allocation5 + $0x1d4] ss:$8 sps:$4 sm:$0xff]  }
  0x58   :  { %761 = vmatpush1.bf16.msra.mxu0 %v1423_v7  ;;  %v1509_v42 = vld [vmem:[#allocation5 + $0x60] ss:$8 sps:$4 sm:$0xff]   ;;  %v1510_v43 = vld [vmem:[#allocation5 + $0x74] ss:$8 sps:$4 sm:$0xff]   ;;  %v1453_v44 = vld [vmem:[#allocation5 + $0x1d0] ss:$8 sps:$4 sm:$0xff]  }
  0x59   :  { %762 = vmatprep.subr.bf16.mxu0 %v1424_v8  ;;  %v1454_v45 = vld [vmem:[#allocation5 + $0x1e4] ss:$8 sps:$4 sm:$0xff]   ;;  %v1515_v46 = vld [vmem:[#allocation5 + $0x70] ss:$8 sps:$4 sm:$0xff]   ;;  %v1456_v48 = vld [vmem:[#allocation5 + $0x1e0] ss:$8 sps:$4 sm:$0xff]  }
  0x5a   :  { %718 = vmatpush1.bf16.msra.mxu1 %v1485_v26  ;;  %v1516_v47 = vld [vmem:[#allocation5 + $0x84] ss:$8 sps:$4 sm:$0xff]   ;;  %v1457_v49 = vld [vmem:[#allocation5 + $0x1f4] ss:$8 sps:$4 sm:$0xff]   ;;  %v1521_v50 = vld [vmem:[#allocation5 + $0x80] ss:$8 sps:$4 sm:$0xff]  }
  0x5b   :  { %719 = vmatprep.subr.bf16.mxu1 %v1486_v27  ;;  %v1522_v51 = vld [vmem:[#allocation5 + $0x94] ss:$8 sps:$4 sm:$0xff]   ;;  %v1459_v52 = vld [vmem:[#allocation5 + $0x1f0] ss:$8 sps:$4 sm:$0xff]   ;;  %v1464_v53 = vld [vmem:[#allocation5 + $0x204] ss:$8 sps:$4 sm:$0xff]  }
  0x5c   :  { %763 = vmatpush1.bf16.msra.mxu0 %v1426_v9  ;;  %v1527_v54 = vld [vmem:[#allocation5 + $0x90] ss:$8 sps:$4 sm:$0xff]   ;;  %v1528_v55 = vld [vmem:[#allocation5 + $0xa4] ss:$8 sps:$4 sm:$0xff]   ;;  %v1462_v58 = vld [vmem:[#allocation5 + $0x200] ss:$8 sps:$4 sm:$0xff]  }
  0x5d   :  { %764 = vmatprep.subr.bf16.mxu0 %v1427_v10  ;;  %v1824_v56 = vld [vmem:[#allocation2 + $0x10] sm:$0xff]  ;;  %v1533_v61 = vld [vmem:[#allocation5 + $0xa0] ss:$8 sps:$4 sm:$0xff]   ;;  %v1472_v0 = vld [vmem:[#allocation5 + $0x224] ss:$8 sps:$4 sm:$0xff]   ;;  %vm1730_vm1 = vmmov 0  }
  0x5e   :  { %720 = vmatpush1.bf16.msra.mxu1 %v1491_v30  ;;  %v1207_v59 = vcombine.high %v1824_v56, %v1824_v56  ;;  %v1467_v60 = vld [vmem:[#allocation5 + $0x214] ss:$8 sps:$4 sm:$0xff]   ;;  %v1465_v62 = vld [vmem:[#allocation5 + $0x210] ss:$8 sps:$4 sm:$0xff]   ;;  %v81_v2 = vld [vmem:[#allocation2] sm:$0xff]  ;;  %s1731_s30 = smov [#allocation10]  }
  0x5f   :  { %721 = vmatprep.subr.bf16.mxu1 %v1492_v31  ;;  %v1534_v63 = vld [vmem:[#allocation5 + $0xb4] ss:$8 sps:$4 sm:$0xff]   ;;  %v1539_v1 = vld [vmem:[#allocation5 + $0xb0] ss:$8 sps:$4 sm:$0xff]   ;;  %v1540_v3 = vld [vmem:[#allocation5 + $0xc4] ss:$8 sps:$4 sm:$0xff]   ;;  %v1203_v4 = vcombine.high %v81_v2, %v81_v2 }
  0x60   :  { %765 = vmatpush1.bf16.msra.mxu0 %v1429_v11  ;;  %v1470_v5 = vld [vmem:[#allocation5 + $0x220] ss:$8 sps:$4 sm:$0xff]   ;;  %v1478_v6 = vld [vmem:[#allocation5 + $0x234] ss:$8 sps:$4 sm:$0xff]   ;;  %v1476_v9 = vld [vmem:[#allocation5 + $0x230] ss:$8 sps:$4 sm:$0xff]  }
  0x61   :  { %766 = vmatprep.subr.bf16.mxu0 %v1430_v12  ;;  %745 = vmatprep.mubr.bf16.mxu1 %v1203_v4  ;;  %v1545_v7 = vld [vmem:[#allocation5 + $0xc0] ss:$8 sps:$4 sm:$0xff]   ;;  %v1546_v8 = vld [vmem:[#allocation5 + $0xd4] ss:$8 sps:$4 sm:$0xff]   ;;  %v1484_v10 = vld [vmem:[#allocation5 + $0x244] ss:$8 sps:$4 sm:$0xff]  }
  0x62   :  { %722 = vmatpush1.bf16.msra.mxu1 %v1497_v34  ;;  %v1551_v11 = vld [vmem:[#allocation5 + $0xd0] ss:$8 sps:$4 sm:$0xff]   ;;  %v1554_v12 = vld [vmem:[#allocation5 + $0xe4] ss:$8 sps:$4 sm:$0xff]   ;;  %v1482_v13 = vld [vmem:[#allocation5 + $0x240] ss:$8 sps:$4 sm:$0xff]  }
  0x63   :  { %723 = vmatprep.subr.bf16.mxu1 %v1498_v35  ;;  %v1490_v14 = vld [vmem:[#allocation5 + $0x254] ss:$8 sps:$4 sm:$0xff]   ;;  %v1488_v17 = vld [vmem:[#allocation5 + $0x250] ss:$8 sps:$4 sm:$0xff]   ;;  %v1494_v20 = vld [vmem:[#allocation5 + $0x260] ss:$8 sps:$4 sm:$0xff]  }
  0x64   :  { %767 = vmatpush1.bf16.msra.mxu0 %v1432_v15  ;;  %v1559_v15 = vld [vmem:[#allocation5 + $0xe0] ss:$8 sps:$4 sm:$0xff]   ;;  %v1562_v19 = vld [vmem:[#allocation5 + $0xf0] ss:$8 sps:$4 sm:$0xff]   ;;  %v1502_v22 = vld [vmem:[#allocation5 + $0x274] ss:$8 sps:$4 sm:$0xff]  }
  0x65   :  { %768 = vmatprep.subr.bf16.mxu0 %v1433_v16  ;;  %v1560_v16 = vld [vmem:[#allocation5 + $0xf4] ss:$8 sps:$4 sm:$0xff]   ;;  %v1500_v23 = vld [vmem:[#allocation5 + $0x270] ss:$8 sps:$4 sm:$0xff]   ;;  %v183_v4 = vld [vmem:[%s1855_s2] sm:$0x3] }
  0x66   :  { %724 = vmatpush1.bf16.msra.mxu1 %v1503_v38  ;;  %v1514_v26 = vld [vmem:[#allocation5 + $0x294] ss:$8 sps:$4 sm:$0xff]   ;;  %v1512_v27 = vld [vmem:[#allocation5 + $0x290] ss:$8 sps:$4 sm:$0xff]   ;;  %s1191_s8 = sshll.u32 %s1731_s30, 4  ;;  %s1192_s8 = int_to_ptr.vmem [resolvable:$true] %s1191_s8 }
  0x67   :  { %725 = vmatprep.subr.bf16.mxu1 %v1504_v39  ;;  %v1526_v30 = vld [vmem:[#allocation5 + $0x2b4] ss:$8 sps:$4 sm:$0xff]   ;;  %v1524_v31 = vld [vmem:[#allocation5 + $0x2b0] ss:$8 sps:$4 sm:$0xff]   ;;  %p1695_p5 = scmp.lt.s32.totalorder %s1192_s8, %s1192_s8 }
  0x68   :  { %769 = vmatpush1.bf16.msra.mxu0 %v1435_v18  ;;  %v1496_v18 = vld [vmem:[#allocation5 + $0x264] ss:$8 sps:$4 sm:$0xff]   ;;  %v1538_v34 = vld [vmem:[#allocation5 + $0x2d4] ss:$8 sps:$4 sm:$0xff]   ;;  %v1536_v35 = vld [vmem:[#allocation5 + $0x2d0] ss:$8 sps:$4 sm:$0xff]  }
  0x69   :  { %770 = vmatprep.subr.bf16.mxu0 %v1436_v21  ;;  %v1202_v21 = vcombine.low %v81_v2, %v81_v2  ;;  %v1550_v38 = vld [vmem:[#allocation5 + $0x2f4] ss:$8 sps:$4 sm:$0xff]   ;;  %v1548_v39 = vld [vmem:[#allocation5 + $0x2f0] ss:$8 sps:$4 sm:$0xff]  }
  0x6a   :  { %726 = vmatpush1.bf16.msra.mxu1 %v1509_v42  ;;  %v1556_v42 = vld [vmem:[#allocation5 + $0x300] ss:$8 sps:$4 sm:$0xff]  }
  0x6b   :  { %727 = vmatprep.subr.bf16.mxu1 %v1510_v43  ;;  %v1728_v43 = vmov 0  }
  0x6c   :  { %771 = vmatpush1.bf16.msra.mxu0 %v1438_v24  ;;  %v1508_v24 = vld [vmem:[#allocation5 + $0x284] ss:$8 sps:$4 sm:$0xff]  }
  0x6d   :  { %772 = vmatprep.subr.bf16.mxu0 %v1439_v25  ;;  %v1506_v25 = vld [vmem:[#allocation5 + $0x280] ss:$8 sps:$4 sm:$0xff]  }
  0x6e   :  { %728 = vmatpush1.bf16.msra.mxu1 %v1515_v46  ;;  %v1567_v46 = vld [vmem:[#allocation7] sm:$0xff]  }
  0x6f   :  { %729 = vmatprep.subr.bf16.mxu1 %v1516_v47  ;;  %v1568_v47 = vld [vmem:[#allocation7 + $0x48] sm:$0xff]  }
  0x70   :  { %773 = vmatpush1.bf16.msra.mxu0 %v1441_v28  ;;  %v1520_v28 = vld [vmem:[#allocation5 + $0x2a4] ss:$8 sps:$4 sm:$0xff]  }
  0x71   :  { %774 = vmatprep.subr.bf16.mxu0 %v1442_v29  ;;  %v1518_v29 = vld [vmem:[#allocation5 + $0x2a0] ss:$8 sps:$4 sm:$0xff]  }
  0x72   :  { %730 = vmatpush1.bf16.msra.mxu1 %v1521_v50  ;;  %v1571_v50 = vld [vmem:[#allocation7 + $0x10] sm:$0xff]  }
  0x73   :  { %731 = vmatprep.subr.bf16.mxu1 %v1522_v51  ;;  %v1572_v51 = vld [vmem:[#allocation7 + $0x58] sm:$0xff]  }
  0x74   :  { %775 = vmatpush1.bf16.msra.mxu0 %v1444_v32  ;;  %v1532_v32 = vld [vmem:[#allocation5 + $0x2c4] ss:$8 sps:$4 sm:$0xff]  }
  0x75   :  { %776 = vmatprep.subr.bf16.mxu0 %v1445_v33  ;;  %v1530_v33 = vld [vmem:[#allocation5 + $0x2c0] ss:$8 sps:$4 sm:$0xff]  }
  0x76   :  { %732 = vmatpush1.bf16.msra.mxu1 %v1527_v54  ;;  %v1575_v54 = vld [vmem:[#allocation7 + $0x20] sm:$0xff]  }
  0x77   :  { %733 = vmatprep.subr.bf16.mxu1 %v1528_v55  ;;  %v1576_v55 = vld [vmem:[#allocation7 + $0x68] sm:$0xff]  }
  0x78   :  { %777 = vmatpush1.bf16.msra.mxu0 %v1447_v36  ;;  %v1544_v36 = vld [vmem:[#allocation5 + $0x2e4] ss:$8 sps:$4 sm:$0xff]  }
  0x79   :  { %778 = vmatprep.subr.bf16.mxu0 %v1448_v37  ;;  %v1542_v37 = vld [vmem:[#allocation5 + $0x2e0] ss:$8 sps:$4 sm:$0xff]  }
  0x7a   :  { %734 = vmatpush1.bf16.msra.mxu1 %v1533_v61 }
  0x7b   :  { %735 = vmatprep.subr.bf16.mxu1 %v1534_v63 }
  0x7c   :  { %779 = vmatpush1.bf16.msra.mxu0 %v1450_v40  ;;  %v1558_v40 = vld [vmem:[#allocation5 + $0x304] ss:$8 sps:$4 sm:$0xff]  }
  0x7d   :  { %780 = vmatprep.subr.bf16.mxu0 %v1451_v41  ;;  %v1206_v41 = vcombine.low %v1824_v56, %v1824_v56  ;;  %v1577_v56 = vld [vmem:[#allocation7 + $0x28] sm:$0xff]  }
  0x7e   :  { %736 = vmatpush1.bf16.msra.mxu1 %v1539_v1  ;;  %v185_v1 = vlaneseq }
  0x7f   :  { %737 = vmatprep.subr.bf16.mxu1 %v1540_v3 }
  0x80   :  { %781 = vmatpush1.bf16.msra.mxu0 %v1453_v44  ;;  %v1565_v44 = vld [vmem:[#allocation2 + $0x18] ss:$0 sps:$4 sm:$0xff]   ;;  %v186_v2 = vshrl.u32 %v185_v1, 7 }
  0x81   :  { %782 = vmatprep.subr.bf16.mxu0 %v1454_v45  ;;  %v1566_v45 = vld [vmem:[#allocation7 + $0x40] sm:$0xff]  }
  0x82   :  { %738 = vmatpush1.bf16.msra.mxu1 %v1545_v7  ;;  %v187_v3 = vsub.s32 0, %v186_v2 }
  0x83   :  { %739 = vmatprep.subr.bf16.mxu1 %v1546_v8 }
  0x84   :  { %783 = vmatpush1.bf16.msra.mxu0 %v1456_v48  ;;  %v1569_v48 = vld [vmem:[#allocation7 + $0x8] sm:$0xff]  }
  0x85   :  { %784 = vmatprep.subr.bf16.mxu0 %v1457_v49  ;;  %v1570_v49 = vld [vmem:[#allocation7 + $0x50] sm:$0xff]  }
  0x86   :  { %740 = vmatpush1.bf16.msra.mxu1 %v1551_v11 }
  0x87   :  { %741 = vmatprep.subr.bf16.mxu1 %v1554_v12 }
  0x88   :  { %785 = vmatpush1.bf16.msra.mxu0 %v1459_v52  ;;  %v1573_v52 = vld [vmem:[#allocation7 + $0x18] sm:$0xff]  }
  0x89   :  { %795 = vmatprep.subr.bf16.mxu0 %v1464_v53  ;;  %v1574_v53 = vld [vmem:[#allocation7 + $0x60] sm:$0xff]  }
  0x8a   :  { %742 = vmatpush1.bf16.msra.mxu1 %v1559_v15 }
  0x8b   :  { %787 = vmatmul.mubr.bf16.vlgmr.msra.gmra.mrb[0].mxu0 %v1204_v57  ;;  %743 = vmatprep.subr.bf16.mxu1 %v1560_v16  ;;  %v1578_v57 = vld [vmem:[#allocation7 + $0x70] sm:$0xff]  }
  0x8c   :  { %796 = vmatpush1.bf16.msra.mxu0 %v1462_v58  ;;  %827 = vmatprep.mubr.bf16.mxu0 %v1207_v59  ;;  %v1579_v58 = vld [vmem:[#allocation7 + $0x30] sm:$0xff]   ;;  %v1580_v59 = vld [vmem:[#allocation7 + $0x78] sm:$0xff]  }
  0x8d   :  { %797 = vmatprep.subr.bf16.mxu0 %v1467_v60  ;;  %v1581_v60 = vld [vmem:[#allocation7 + $0x38] sm:$0xff]  }
  0x8e   :  { %744 = vmatpush1.bf16.msra.mxu1 %v1562_v19 }
  0x8f   :  { %1337 = vmatprep.subr.bf16.mxu1 %v1566_v45 }
  0x90   :  { %798 = vmatpush1.bf16.msra.mxu0 %v1465_v62 }
  0x91   :  { %799 = vmatprep.subr.bf16.mxu0 %v1472_v0  ;;  %746 = vmatmul.mubr.bf16.vlgmr.msra.gmra.mrb[0].mxu1 %v1202_v21 }
  0x92   :  { %1338 = vmatpush3.bf16.msra.mxu1 %v1567_v46 }
  0x93   :  { %1339 = vmatprep.subr.bf16.mxu1 %v1568_v47  ;;  %v1328_v47 = vld [vmem:[%s1859_s6] ss:$0 sm:$0xff] }
  0x94   :  { %800 = vmatpush1.bf16.msra.mxu0 %v1470_v5  ;;  %v191_v5 = vsub.s32 1, %v186_v2 }
  0x95   :  { %801 = vmatprep.subr.bf16.mxu0 %v1478_v6  ;;  %v188_v6 = vrot.slane %v183_v4, %v187_v3 }
  0x96   :  { %1340 = vmatpush3.bf16.msra.mxu1 %v1569_v48  ;;  %v192_v7 = vrot.slane %v183_v4, %v191_v5 }
  0x97   :  { %1341 = vmatprep.subr.bf16.mxu1 %v1570_v49 }
  0x98   :  { %802 = vmatpush1.bf16.msra.mxu0 %v1476_v9 }
  0x99   :  { %803 = vmatprep.subr.bf16.mxu0 %v1484_v10 }
  0x9a   :  { %1342 = vmatpush3.bf16.msra.mxu1 %v1571_v50 }
  0x9b   :  { %1343 = vmatprep.subr.bf16.mxu1 %v1572_v51 }
  0x9c   :  { %804 = vmatpush1.bf16.msra.mxu0 %v1482_v13 }
  0x9d   :  { %805 = vmatprep.subr.bf16.mxu0 %v1490_v14 }
  0x9e   :  { %1344 = vmatpush3.bf16.msra.mxu1 %v1573_v52 }
  0x9f   :  { %1345 = vmatprep.subr.bf16.mxu1 %v1574_v53 }
  0xa0   :  { %806 = vmatpush1.bf16.msra.mxu0 %v1488_v17 }
  0xa1   :  { %807 = vmatprep.subr.bf16.mxu0 %v1496_v18 }
  0xa2   :  { %1346 = vmatpush3.bf16.msra.mxu1 %v1575_v54 }
  0xa3   :  { %1347 = vmatprep.subr.bf16.mxu1 %v1576_v55 }
  0xa4   :  { %808 = vmatpush1.bf16.msra.mxu0 %v1494_v20 }
  0xa5   :  { %809 = vmatprep.subr.bf16.mxu0 %v1502_v22 }
  0xa6   :  { %1348 = vmatpush3.bf16.msra.mxu1 %v1577_v56 }
  0xa7   :  { %1349 = vmatprep.subr.bf16.mxu1 %v1578_v57 }
  0xa8   :  { %810 = vmatpush1.bf16.msra.mxu0 %v1500_v23 }
  0xa9   :  { %811 = vmatprep.subr.bf16.mxu0 %v1508_v24 }
  0xaa   :  { %1350 = vmatpush3.bf16.msra.mxu1 %v1579_v58 }
  0xab   :  { %1351 = vmatprep.subr.bf16.mxu1 %v1580_v59 }
  0xac   :  { %812 = vmatpush1.bf16.msra.mxu0 %v1506_v25 }
  0xad   :  { %813 = vmatprep.subr.bf16.mxu0 %v1514_v26  ;;  %v1582_v26 = vld [vmem:[#allocation8] sm:$0xff]  }
  0xae   :  { %1352 = vmatpush3.bf16.msra.mxu1 %v1581_v60 }
  0xb0   :  { %814 = vmatpush1.bf16.msra.mxu0 %v1512_v27  ;;  %v1729_v27 = vmov 0.0  }
  0xb1   :  { %815 = vmatprep.subr.bf16.mxu0 %v1520_v28  ;;  %1368 = vmatprep.subr.bf16.mxu1 %v1729_v27  ;;  %v1583_v28 = vld [vmem:[#allocation8 + $0x8] sm:$0xff]  }
  0xb4   :  { %816 = vmatpush1.bf16.msra.mxu0 %v1518_v29  ;;  %v1584_v29 = vld [vmem:[#allocation8 + $0x10] sm:$0xff]  }
  0xb5   :  { %817 = vmatprep.subr.bf16.mxu0 %v1526_v30  ;;  %v1585_v30 = vld [vmem:[#allocation8 + $0x18] sm:$0xff]  }
  0xb8   :  { %818 = vmatpush1.bf16.msra.mxu0 %v1524_v31  ;;  %v1586_v31 = vld [vmem:[#allocation8 + $0x20] sm:$0xff]  }
  0xb9   :  { %819 = vmatprep.subr.bf16.mxu0 %v1532_v32  ;;  %v1587_v32 = vld [vmem:[#allocation8 + $0x28] sm:$0xff]  }
  0xbc   :  { %820 = vmatpush1.bf16.msra.mxu0 %v1530_v33  ;;  %v1588_v33 = vld [vmem:[#allocation8 + $0x30] sm:$0xff]  }
  0xbd   :  { %821 = vmatprep.subr.bf16.mxu0 %v1538_v34  ;;  %v1589_v34 = vld [vmem:[#allocation8 + $0x38] sm:$0xff]  }
  0xc0   :  { %822 = vmatpush1.bf16.msra.mxu0 %v1536_v35 }
  0xc1   :  { %823 = vmatprep.subr.bf16.mxu0 %v1544_v36  ;;  %v1310_v36 = vld [vmem:[%s1857_s4] ss:$0 sm:$0xff]  ;;  %s1690_s4 = scalar_lea.vmem %s1192_s8, 128 }
  0xc2   :  { %p1691_p4 = scmp.ne.s32.totalorder %s1192_s8, %s1690_s4  ;;  %p1696_p6 = scmp.lt.s32.totalorder %s1690_s4, %s1690_s4 }
  0xc4   :  { %824 = vmatpush1.bf16.msra.mxu0 %v1542_v37  ;;  %p1697_p7 = por %p1696_p6, %p1695_p5 }
  0xc5   :  { %825 = vmatprep.subr.bf16.mxu0 %v1550_v38 }
  0xc6   :  { %p1698_p8 = pnand %p1697_p7, %p1691_p4 }
  0xc8   :  { %826 = vmatpush1.bf16.msra.mxu0 %v1548_v39 }
  0xc9   :  { %836 = vmatprep.subr.bf16.mxu0 %v1558_v40 }
  0xcb   :  { %828 = vmatmul.mubr.bf16.vlgmr.msra.gmra.mrb[0].mxu0 %v1206_v41 }
  0xcc   :  { %837 = vmatpush1.bf16.msra.mxu0 %v1556_v42  ;;  %868 = vmatprep.mubr.bf16.mxu0 %v1728_v43 }
  0xd7   :  { %1307 = vmatmul.mubr.msk.bf16.vlgmr.msra.gmra.mrb[0].mxu0 %vm709_vm0, %v1565_v44 }
 0x164   :  { %v747_v61 = vpop.f32.mrb[0].mxu1 }
 0x165   :  { %v749_v62 = vpop.f32.mrb[1].mxu1  ;;  %v748_v8 = vadd.f32 %v747_v61, %v188_v6 }
 0x166   :  { %v751_v63 = vpop.f32.mrb[2].mxu1  ;;  %v750_v9 = vadd.f32 %v749_v62, %v192_v7 }
 0x167   :  { %v752_v0 = vpop.f32.mrb[3].mxu1 }
 0x1aa   :  { %v870_v10 = vpop.f32.mrb[0].mxu0 }
 0x1ab   :  { %v1389_v11 = vadd.f32 %v870_v10, %v748_v8  ;;  %v872_v12 = vpop.f32.mrb[1].mxu0 }
 0x1ac   :  { %v1391_v13 = vadd.f32 %v872_v12, %v750_v9  ;;  %v874_v14 = vpop.f32.mrb[2].mxu0 }
 0x1ad   :  { %v1308_v15 = vmul.f32 -1.442695, %v1389_v11  ;;  %v875_v16 = vpop.f32.mrb[3].mxu0 }
 0x1ae   :  { %v1309_v17 = vmul.f32 -1.442695, %v1391_v13 }
 0x1af   :  { %1590 = vpow2.f32 %v1308_v15 }
 0x1b0   :  { %1592 = vpow2.f32 %v1309_v17 }
 0x1b9   :  { %v1591_v18 = vpop.eup %1590 }
 0x1ba   :  { %v1593_v19 = vpop.eup %1592  ;;  %v883_v20 = vadd.f32 1.0, %v1591_v18 }
 0x1bb   :  { %v884_v21 = vadd.f32 1.0, %v1593_v19 }
 0x1bc   :  { %1594 = vrcp.f32 %v883_v20 }
 0x1bd   :  { %1596 = vrcp.f32 %v884_v21 }
 0x1c6   :  { %v1595_v22 = vpop.eup %1594 }
 0x1c7   :  { %v1597_v23 = vpop.eup %1596  ;;  %v889_v25 = vpack.c.bf16 %v1595_v22, %v1595_v22 }
 0x1c8   :  { %v890_v24 = vpack.c.bf16 %v1597_v23, %v1597_v23 }
 0x1ca   :  { %1058 = vmatprep.mubr.bf16.mxu1 %v890_v24 }
 0x1cb   :  { %1059 = vmatmul.mubr.bf16.vlgmr.msra.gmra.mrb[4].mxu1 %v889_v25 }
 0x1cc   :  { %1369 = vmatpush3.bf16.msra.mxu1 %v1582_v26  ;;  %1384 = vmatprep.mubr.msk.bf16.mxu1 %vm1730_vm1, %v1729_v27 }
 0x1cd   :  { %1370 = vmatprep.subr.bf16.mxu1 %v1729_v27 }
 0x1d0   :  { %1371 = vmatpush3.bf16.msra.mxu1 %v1583_v28 }
 0x1d1   :  { %1372 = vmatprep.subr.bf16.mxu1 %v1729_v27 }
 0x1d4   :  { %1373 = vmatpush3.bf16.msra.mxu1 %v1584_v29 }
 0x1d5   :  { %1374 = vmatprep.subr.bf16.mxu1 %v1729_v27 }
 0x1d8   :  { %1375 = vmatpush3.bf16.msra.mxu1 %v1585_v30 }
 0x1d9   :  { %1376 = vmatprep.subr.bf16.mxu1 %v1729_v27 }
 0x1dc   :  { %1377 = vmatpush3.bf16.msra.mxu1 %v1586_v31 }
 0x1dd   :  { %1378 = vmatprep.subr.bf16.mxu1 %v1729_v27 }
 0x1e0   :  { %1379 = vmatpush3.bf16.msra.mxu1 %v1587_v32 }
 0x1e1   :  { %1380 = vmatprep.subr.bf16.mxu1 %v1729_v27 }
 0x1e4   :  { %1381 = vmatpush3.bf16.msra.mxu1 %v1588_v33 }
 0x1e5   :  { %1382 = vmatprep.subr.bf16.mxu1 %v1729_v27 }
 0x1e8   :  { %1383 = vmatpush3.bf16.msra.mxu1 %v1589_v34 }
 0x29e   :  { %v1353_v35 = vpop.f32.mrb[4].mxu1 }
 0x29f   :  { %v1354_v37 = vpop.f32.mrb[5].mxu1 }
 0x2a0   :  { %v1355_v38 = vadd.f32 %v1354_v37, %v1353_v35  ;;  %v1356_v39 = vpop.f32.mrb[6].mxu1 }
 0x2a1   :  { %v1357_v40 = vpop.f32.mrb[7].mxu1 }
 0x2a2   :  { %v1061_v41 = vadd.f32 %v1355_v38, %v1310_v36 }
 0x2a4   :  { %v1327_v42 = vmul.f32 -1.442695, %v1061_v41 }
 0x2a6   :  { %1598 = vpow2.f32 %v1327_v42 }
 0x2b0   :  { %v1599_v43 = vpop.eup %1598 }
 0x2b1   :  { %v1069_v44 = vadd.f32 1.0, %v1599_v43 }
 0x2b3   :  { %1600 = vrcp.f32 %v1069_v44 }
 0x2bd   :  { %v1601_v45 = vpop.eup %1600 }
 0x2be   :  { %v1072_v46 = vpack.c.bf16 %v1601_v45, %v1601_v45 }
 0x2c0   :  { %1385 = vmatmul.mubr.bf16.vlgmr.msra.gmra.mrb[8].mxu1 %v1072_v46 }
 0x393   :  { %v1178_v48 = vpop.f32.mrb[8].mxu1 }
 0x394   :  { %v1179_v49 = vadd.f32 %v1328_v47, %v1178_v48  ;;  %v1386_v50 = vpop.f32.mrb[9].mxu1 }
 0x395   :  { %v1181_v51 = vpop.f32.mrb[10].mxu1 }
 0x396   :  { %1184 = vst [vmem:[#allocation10] sm:$0xff] %v1179_v49  ;;  %v1387_v52 = vpop.f32.mrb[11].mxu1 }
 0x397   :  { %1701 = shalt.err (!%p1698_p8)
}
 0x398   :  { %s1702_s6 = scalar_lea.hbm %s1860_s7, 128 }
 0x399   :  { %p1703_p9 = scmp.ne.s32.totalorder %s1860_s7, %s1702_s6  ;;  %p1706_p10 = scmp.lt.u32.totalorder %s1702_s6, %s1860_s7 }
 0x39b   :  { %p1708_p11 = pnand %p1706_p10, %p1703_p9 }
 0x39d   :  { %1711 = shalt.err (!%p1708_p11)
}
 0x39e   :  { %1194 = dma.vmem_to_hbm [thread:$0]  %s1192_s8, 128, %s1860_s7, [#allocation4]  }
 0x39f   :  { %1718 = dma.done.wait [#allocation4], 128  }
 0x3a0   :  { %1719 = vsyncadd [#allocation4], 4294967168 }
 0x3a1   :  { %1198 = vsyncpa [#allocation3], 1 }
 0x3a2   :  { %1199 = vsyncpa [#allocation6], 1 }
 0x3a3   :  { %1200 = vsyncpa [#allocation9], 1 }
 0x3a4   :  { %1201 = vsyncpa [#allocation4], 1 }

</bundles_post_ra>
